<compile_context>
chip_gen: v7x
topology: tpu7x:2x2x1
jax: 0.10.0
libtpu: 0.0.40
codegen_flags: <defaults>
</compile_context>

<pallas_src>
import functools

import jax
import jax.numpy as jnp
from jax import lax
from jax.experimental import pallas as pl
from jax.experimental.pallas import tpu as pltpu

EPS = 1e-5
MOMENTUM = 0.1
_MIB = 1024 * 1024


def _vmem_budget():
    """Generation-aware scoped-VMEM limit and x/y tile budget (bytes)."""
    vmem_cap = 64 * _MIB                      # v7x per-TC capacity (safe floor)
    try:
        vmem_cap = pltpu.get_tpu_info().vmem_capacity_bytes
    except Exception:
        pass                                  # fall back to the v7x-safe floor
    vmem_limit = (vmem_cap * 3) // 4          # ~48 MiB on v7x, ~96 MiB on v5e/v6e
    budget = vmem_limit - 8 * _MIB            # headroom: row buffers + internal scratch
    return vmem_limit, budget


# ---------------------------------------------------------------------------
# Main single-pass kernel: one feature tile (N, TD) per grid step.
# ---------------------------------------------------------------------------
def _bn_kernel(x_ref, gamma_ref, beta_ref, rmean_ref, rvar_ref,
               y_ref, new_rmean_ref, new_rvar_ref):
    n, td = x_ref.shape
    x = x_ref[...].astype(jnp.float32)                      # (N, TD)

    # Sublane (batch) reductions -> (1, TD) rows; one pass over the x tile.
    s = jnp.sum(x, axis=0, keepdims=True)
    sq = jnp.sum(x * x, axis=0, keepdims=True)
    mean = s * (1.0 / n)
    # One-pass UNBIASED variance (matches torch.var(dim=0) default).
    inv_nm1 = (1.0 / (n - 1)) if n > 1 else float("nan")    # n==1 -> NaN, like torch
    var = (sq - n * (mean * mean)) * inv_nm1

    # gamma/beta are resident full-width rows; slice this tile's lanes.
    col0 = pl.multiple_of(pl.program_id(0) * td, 128)
    gamma = gamma_ref[:, pl.ds(col0, td)]                    # (1, TD)
    beta = beta_ref[:, pl.ds(col0, td)]                      # (1, TD)

    inv_std = lax.rsqrt(var + EPS)                           # EUP op
    scale = gamma * inv_std                                  # (1, TD)
    shift = beta - mean * scale                              # (1, TD)
    y_ref[...] = (x * scale + shift).astype(y_ref.dtype)

    # Running-stat update: each feature tile owns its slice (aliased in-place).
    new_rmean_ref[...] = ((1.0 - MOMENTUM) * rmean_ref[...]
                          + MOMENTUM * mean).astype(new_rmean_ref.dtype)
    new_rvar_ref[...] = ((1.0 - MOMENTUM) * rvar_ref[...]
                         + MOMENTUM * var).astype(new_rvar_ref.dtype)


# ---------------------------------------------------------------------------
# Large-N fallback: two pallas_calls (stats accumulation, then scale/shift).
# ---------------------------------------------------------------------------
def _stats_kernel(x_ref, sum_ref, sumsq_ref, *, tn, n_total):
    nj = pl.program_id(1)                                    # N-tile index (last, arbitrary)

    @pl.when(nj == 0)
    def _():
        sum_ref[...] = jnp.zeros_like(sum_ref)
        sumsq_ref[...] = jnp.zeros_like(sumsq_ref)

    x = x_ref[...].astype(jnp.float32)                       # (TN, TD)
    rows = lax.broadcasted_iota(jnp.int32, x.shape, 0) + nj * tn
    x = jnp.where(rows < n_total, x, 0.0)                    # mask ragged batch tail
    sum_ref[...] += jnp.sum(x, axis=0, keepdims=True)
    sumsq_ref[...] += jnp.sum(x * x, axis=0, keepdims=True)


def _scale_shift_kernel(x_ref, scale_ref, shift_ref, y_ref):
    y_ref[...] = (x_ref[...].astype(jnp.float32) * scale_ref[...]
                  + shift_ref[...]).astype(y_ref.dtype)


def _batchnorm_two_pass(x, gamma, beta, running_mean, running_var,
                        *, budget, vmem_limit, tn_override=None):
    """Fallback when a full-N feature tile does not fit VMEM (3 HBM passes)."""
    n, d = x.shape
    xb = x.dtype.itemsize
    d_ceil = ((d + 127) // 128) * 128
    td = min(d_ceil, 512)

    # Pass 2 is the VMEM-heavy one: double-buffered x in + y out per tile.
    tn = budget // (2 * td * (xb + xb) + 1024)
    tn = max(8, (tn // 8) * 8)
    if tn_override is not None:
        tn = tn_override
    tn = min(tn, ((n + 7) // 8) * 8)

    d_tiles = pl.cdiv(d, td)
    n_tiles = pl.cdiv(n, tn)

    x_spec = pl.BlockSpec((tn, td), lambda i, j: (j, i))
    row_spec = pl.BlockSpec((1, td), lambda i, j: (0, i))

    # Pass 1: per-feature sum and sum-of-squares, N axis last ("arbitrary"),
    # accumulated into resident (1, TD) output blocks.
    sums, sumsq = pl.pallas_call(
        functools.partial(_stats_kernel, tn=tn, n_total=n),
        grid=(d_tiles, n_tiles),
        in_specs=[x_spec],
        out_specs=(row_spec, row_spec),
        out_shape=(jax.ShapeDtypeStruct((1, d), jnp.float32),
                   jax.ShapeDtypeStruct((1, d), jnp.float32)),
        compiler_params=pltpu.CompilerParams(
            dimension_semantics=("parallel", "arbitrary"),
            vmem_limit_bytes=vmem_limit,
        ),
    )(x)

    # Tiny O(D) wrapper math.
    mean = sums * (1.0 / n)
    inv_nm1 = (1.0 / (n - 1)) if n > 1 else float("nan")
    var = (sumsq - n * (mean * mean)) * inv_nm1
    scale = gamma.reshape(1, d).astype(jnp.float32) * lax.rsqrt(var + EPS)
    shift = beta.reshape(1, d).astype(jnp.float32) - mean * scale

    # Pass 2: normalize.
    y = pl.pallas_call(
        _scale_shift_kernel,
        grid=(d_tiles, n_tiles),
        in_specs=[x_spec, row_spec, row_spec],
        out_specs=x_spec,
        out_shape=jax.ShapeDtypeStruct((n, d), x.dtype),
        compiler_params=pltpu.CompilerParams(
            dimension_semantics=("parallel", "parallel"),
            vmem_limit_bytes=vmem_limit,
        ),
    )(x, scale, shift)

    new_rmean = (1.0 - MOMENTUM) * running_mean.astype(jnp.float32) + MOMENTUM * mean[0]
    new_rvar = (1.0 - MOMENTUM) * running_var.astype(jnp.float32) + MOMENTUM * var[0]
    return y, new_rmean, new_rvar


# ---------------------------------------------------------------------------
# Public wrapper.
# ---------------------------------------------------------------------------
def batchnorm_forward(x, gamma, beta, running_mean, running_var,
                      *, _force_two_pass=False, _tn_override=None):
    """Training-mode BatchNorm forward.

    x: (N, D) float32 or bfloat16.  gamma/beta/running_mean/running_var: (D,).
    Returns (y, new_running_mean, new_running_var); y has x's dtype, stats f32.
    """
    n, d = x.shape
    xb = x.dtype.itemsize
    d_ceil = ((d + 127) // 128) * 128

    vmem_limit, budget = _vmem_budget()

    # Size the feature tile: largest multiple of 128 lanes whose double-buffered
    # (N, TD) x-in + y-out tiles (plus the tiny per-tile stat rows) fit the
    # budget, after reserving space for the resident gamma/beta rows.
    avail = budget - 64 * d_ceil
    per_lane = 2 * n * (xb + xb) + 32
    td = min(d_ceil, (avail // per_lane) // 128 * 128) if avail > 0 else 0

    if _force_two_pass or td < 128:
        # Full-N feature tile does not fit VMEM: degrade to two passes over x.
        return _batchnorm_two_pass(x, gamma, beta, running_mean, running_var,
                                   budget=budget, vmem_limit=vmem_limit,
                                   tn_override=_tn_override)

    d_tiles = pl.cdiv(d, td)
    d_cols = d_tiles * td
    # TODO(synk): on v7x, nudging TD so d_tiles is even (>=2 per TensorCore)
    # would balance the megacore split when d_tiles is small and odd.

    # Only the tiny (D,) parameter rows are padded (to the tiled width); the
    # big (N, D) x / y arrays are NOT padded or sliced.
    def _row(a, fill):
        a = a.reshape(1, d).astype(jnp.float32)
        if d_cols != d:
            a = jnp.pad(a, ((0, 0), (0, d_cols - d)), constant_values=fill)
        return a

    gamma2 = _row(gamma, 1.0)
    beta2 = _row(beta, 0.0)
    rmean2 = _row(running_mean, 0.0)
    rvar2 = _row(running_var, 1.0)

    x_spec = pl.BlockSpec((n, td), lambda j: (0, j))          # partial last tile OK
    resident_row = pl.BlockSpec((1, d_cols), lambda j: (0, 0))  # fetched once
    tile_row = pl.BlockSpec((1, td), lambda j: (0, j))

    y, new_rmean_p, new_rvar_p = pl.pallas_call(
        _bn_kernel,
        grid=(d_tiles,),
        in_specs=[x_spec, resident_row, resident_row, tile_row, tile_row],
        out_specs=(x_spec, tile_row, tile_row),
        out_shape=(
            jax.ShapeDtypeStruct((n, d), x.dtype),
            jax.ShapeDtypeStruct((1, d_cols), jnp.float32),
            jax.ShapeDtypeStruct((1, d_cols), jnp.float32),
        ),
        # Reuse the running-stat buffers in place (PyTorch buffer semantics).
        input_output_aliases={3: 1, 4: 2},
        compiler_params=pltpu.CompilerParams(
            dimension_semantics=("parallel",),
            vmem_limit_bytes=vmem_limit,
        ),
    )(x, gamma2, beta2, rmean2, rvar2)

    return y, new_rmean_p[0, :d], new_rvar_p[0, :d]


# ---------------------------------------------------------------------------
# Reference + self-test.
# ---------------------------------------------------------------------------
def _reference(x, gamma, beta, running_mean, running_var):
    xf = x.astype(jnp.float32)
    mean = jnp.mean(xf, axis=0)
    var = jnp.var(xf, axis=0, ddof=1)        # unbiased, like torch.var default
    new_rmean = (1 - MOMENTUM) * running_mean + MOMENTUM * mean
    new_rvar = (1 - MOMENTUM) * running_var + MOMENTUM * var
    y = gamma * (xf - mean) / jnp.sqrt(var + EPS) + beta
    return y, new_rmean, new_rvar


if __name__ == "__main__":
    k1, k2, k3, k4, k5, k6, k7 = jax.random.split(jax.random.PRNGKey(0), 7)

    # --- Test 1: main single-pass path (small FC layer shape, D not a
    # multiple of 128 -> partial lane tile, no padding of x). ---
    N, D = 8, 32
    x = jax.random.normal(k1, (N, D), dtype=jnp.float32)
    gamma = jnp.ones((D,), jnp.float32)
    beta = jnp.zeros((D,), jnp.float32)
    running_mean = jnp.zeros((D,), jnp.float32)
    running_var = jnp.ones((D,), jnp.float32)

    y_ref, rm_ref, rv_ref = _reference(x, gamma, beta, running_mean, running_var)
    y, new_rmean, new_rvar = batchnorm_forward(x, gamma, beta,
                                               running_mean, running_var)
    jax.block_until_ready((y, new_rmean, new_rvar))
    assert jnp.allclose(y, y_ref, atol=1e-5, rtol=1e-4)
    assert jnp.allclose(new_rmean, rm_ref, atol=1e-5, rtol=1e-4)
    assert jnp.allclose(new_rvar, rv_ref, atol=1e-5, rtol=1e-4)

    # --- Test 2: forced large-N fallback (two-pass) path at a small size,
    # with a ragged batch tail and ragged feature tail. ---
    N2, D2 = 13, 200
    x2 = jax.random.normal(k2, (N2, D2), dtype=jnp.float32)
    gamma2 = 1.0 + 0.1 * jax.random.normal(k3, (D2,), dtype=jnp.float32)
    beta2 = 0.1 * jax.random.normal(k4, (D2,), dtype=jnp.float32)
    rmean2 = 0.05 * jax.random.normal(k5, (D2,), dtype=jnp.float32)
    rvar2 = 1.0 + 0.1 * jnp.abs(jax.random.normal(k6, (D2,), dtype=jnp.float32))

    y2_ref, rm2_ref, rv2_ref = _reference(x2, gamma2, beta2, rmean2, rvar2)
    y2, rm2, rv2 = batchnorm_forward(x2, gamma2, beta2, rmean2, rvar2,
                                     _force_two_pass=True, _tn_override=8)
    jax.block_until_ready((y2, rm2, rv2))
    assert jnp.allclose(y2, y2_ref, atol=1e-5, rtol=1e-4)
    assert jnp.allclose(rm2, rm2_ref, atol=1e-5, rtol=1e-4)
    assert jnp.allclose(rv2, rv2_ref, atol=1e-5, rtol=1e-4)

    # --- Test 3: bf16 activations (dtype-aware path; stats stay f32). ---
    N3, D3 = 8, 128
    x3 = jax.random.normal(k7, (N3, D3), dtype=jnp.float32).astype(jnp.bfloat16)
    gamma3 = jnp.ones((D3,), jnp.float32)
    beta3 = jnp.zeros((D3,), jnp.float32)
    rmean3 = jnp.zeros((D3,), jnp.float32)
    rvar3 = jnp.ones((D3,), jnp.float32)

    y3_ref, rm3_ref, rv3_ref = _reference(x3, gamma3, beta3, rmean3, rvar3)
    y3, rm3, rv3 = batchnorm_forward(x3, gamma3, beta3, rmean3, rvar3)
    jax.block_until_ready((y3, rm3, rv3))
    assert y3.dtype == jnp.bfloat16
    assert jnp.allclose(y3.astype(jnp.float32), y3_ref, atol=3e-2, rtol=3e-2)
    assert jnp.allclose(rm3, rm3_ref, atol=1e-5, rtol=1e-4)
    assert jnp.allclose(rv3, rv3_ref, atol=1e-5, rtol=1e-4)

    print("KERNEL_OK")
</pallas_src>

<mosaic_0001>
module attributes {stable_mosaic.version = 11 : i64} {
  func.func @_bn_kernel(%arg0: i32, %arg1: memref<8x128xf32, #tpu.memory_space<vmem>>, %arg2: memref<1x128xf32, #tpu.memory_space<vmem>>, %arg3: memref<1x128xf32, #tpu.memory_space<vmem>>, %arg4: memref<1x128xf32, #tpu.memory_space<vmem>>, %arg5: memref<1x128xf32, #tpu.memory_space<vmem>>, %arg6: memref<8x128xf32, #tpu.memory_space<vmem>>, %arg7: memref<1x128xf32, #tpu.memory_space<vmem>>, %arg8: memref<1x128xf32, #tpu.memory_space<vmem>>) attributes {dimension_semantics = [#tpu.dimension_semantics<parallel>], iteration_bounds = array<i64: 1>, scalar_prefetch = 0 : i64, scratch_operands = 0 : i64, tpu.core_type = #tpu.core_type<tc>, window_params = [{transform_indices = @transform_0, window_bounds = array<i64: 8, 128>}, {pipeline_mode = #tpu.pipeline_mode<synchronous>, transform_indices = @transform_1, window_bounds = array<i64: 1, 128>}, {pipeline_mode = #tpu.pipeline_mode<synchronous>, transform_indices = @transform_2, window_bounds = array<i64: 1, 128>}, {transform_indices = @transform_3, window_bounds = array<i64: 1, 128>}, {transform_indices = @transform_4, window_bounds = array<i64: 1, 128>}, {transform_indices = @transform_5, window_bounds = array<i64: 8, 128>}, {transform_indices = @transform_6, window_bounds = array<i64: 1, 128>}, {transform_indices = @transform_7, window_bounds = array<i64: 1, 128>}]} {
    %c0 = arith.constant 0 : index
    %c0_0 = arith.constant 0 : index
    %0 = vector.load %arg1[%c0, %c0_0] : memref<8x128xf32, #tpu.memory_space<vmem>>, vector<8x128xf32>
    %cst = arith.constant dense<0.000000e+00> : vector<128xf32>
    %1 = vector.multi_reduction <add>, %0, %cst [0] : vector<8x128xf32> to vector<128xf32>
    %2 = vector.shape_cast %1 : vector<128xf32> to vector<1x128xf32>
    %3 = arith.mulf %0, %0 : vector<8x128xf32>
    %cst_1 = arith.constant dense<0.000000e+00> : vector<128xf32>
    %4 = vector.multi_reduction <add>, %3, %cst_1 [0] : vector<8x128xf32> to vector<128xf32>
    %5 = vector.shape_cast %4 : vector<128xf32> to vector<1x128xf32>
    %cst_2 = arith.constant 1.250000e-01 : f32
    %6 = vector.broadcast %cst_2 : f32 to vector<1x128xf32>
    %7 = arith.mulf %2, %6 : vector<1x128xf32>
    %8 = arith.mulf %7, %7 : vector<1x128xf32>
    %cst_3 = arith.constant 8.000000e+00 : f32
    %9 = vector.broadcast %cst_3 : f32 to vector<1x128xf32>
    %10 = arith.mulf %9, %8 : vector<1x128xf32>
    %11 = arith.subf %5, %10 : vector<1x128xf32>
    %cst_4 = arith.constant 0.142857149 : f32
    %12 = vector.broadcast %cst_4 : f32 to vector<1x128xf32>
    %13 = arith.mulf %11, %12 : vector<1x128xf32>
    %c128_i32 = arith.constant 128 : i32
    %14 = arith.muli %arg0, %c128_i32 : i32
    %15 = tpu.assume_multiple %14, 128 : i32
    %c0_5 = arith.constant 0 : index
    %16 = arith.index_cast %15 : i32 to index
    %17 = vector.load %arg2[%c0_5, %16] : memref<1x128xf32, #tpu.memory_space<vmem>>, vector<1x128xf32>
    %c0_6 = arith.constant 0 : index
    %18 = arith.index_cast %15 : i32 to index
    %19 = vector.load %arg3[%c0_6, %18] : memref<1x128xf32, #tpu.memory_space<vmem>>, vector<1x128xf32>
    %cst_7 = arith.constant 9.99999974E-6 : f32
    %20 = vector.broadcast %cst_7 : f32 to vector<1x128xf32>
    %21 = arith.addf %13, %20 : vector<1x128xf32>
    %22 = math.rsqrt %21 : vector<1x128xf32>
    %23 = arith.mulf %17, %22 : vector<1x128xf32>
    %24 = arith.mulf %7, %23 : vector<1x128xf32>
    %25 = arith.subf %19, %24 : vector<1x128xf32>
    %26 = vector.broadcast %23 : vector<1x128xf32> to vector<8x128xf32>
    %27 = arith.mulf %0, %26 : vector<8x128xf32>
    %28 = vector.broadcast %25 : vector<1x128xf32> to vector<8x128xf32>
    %29 = arith.addf %27, %28 : vector<8x128xf32>
    %c0_8 = arith.constant 0 : index
    %c0_9 = arith.constant 0 : index
    %30 = vector.load %arg6[%c0_8, %c0_9] : memref<8x128xf32, #tpu.memory_space<vmem>>, vector<8x128xf32>
    tpu.vector_store %arg6[%c0_8, %c0_9], %29 {strides = array<i32>} : memref<8x128xf32, #tpu.memory_space<vmem>>, vector<8x128xf32>,
    %c0_10 = arith.constant 0 : index
    %c0_11 = arith.constant 0 : index
    %31 = vector.load %arg4[%c0_10, %c0_11] : memref<1x128xf32, #tpu.memory_space<vmem>>, vector<1x128xf32>
    %cst_12 = arith.constant 0.899999976 : f32
    %32 = vector.broadcast %cst_12 : f32 to vector<1x128xf32>
    %33 = arith.mulf %32, %31 : vector<1x128xf32>
    %cst_13 = arith.constant 1.000000e-01 : f32
    %34 = vector.broadcast %cst_13 : f32 to vector<1x128xf32>
    %35 = arith.mulf %34, %7 : vector<1x128xf32>
    %36 = arith.addf %33, %35 : vector<1x128xf32>
    %c0_14 = arith.constant 0 : index
    %c0_15 = arith.constant 0 : index
    %37 = vector.load %arg7[%c0_14, %c0_15] : memref<1x128xf32, #tpu.memory_space<vmem>>, vector<1x128xf32>
    tpu.vector_store %arg7[%c0_14, %c0_15], %36 {strides = array<i32>} : memref<1x128xf32, #tpu.memory_space<vmem>>, vector<1x128xf32>,
    %c0_16 = arith.constant 0 : index
    %c0_17 = arith.constant 0 : index
    %38 = vector.load %arg5[%c0_16, %c0_17] : memref<1x128xf32, #tpu.memory_space<vmem>>, vector<1x128xf32>
    %cst_18 = arith.constant 0.899999976 : f32
    %39 = vector.broadcast %cst_18 : f32 to vector<1x128xf32>
    %40 = arith.mulf %39, %38 : vector<1x128xf32>
    %cst_19 = arith.constant 1.000000e-01 : f32
    %41 = vector.broadcast %cst_19 : f32 to vector<1x128xf32>
    %42 = arith.mulf %41, %13 : vector<1x128xf32>
    %43 = arith.addf %40, %42 : vector<1x128xf32>
    %c0_20 = arith.constant 0 : index
    %c0_21 = arith.constant 0 : index
    %44 = vector.load %arg8[%c0_20, %c0_21] : memref<1x128xf32, #tpu.memory_space<vmem>>, vector<1x128xf32>
    tpu.vector_store %arg8[%c0_20, %c0_21], %43 {strides = array<i32>} : memref<1x128xf32, #tpu.memory_space<vmem>>, vector<1x128xf32>,
    return
  }
  func.func @transform_0(%arg0: i32) -> (i32, i32) {
    %c0_i32 = arith.constant 0 : i32
    %c0_i32_0 = arith.constant 0 : i32
    return %c0_i32, %arg0 : i32, i32
  }
  func.func @transform_1(%arg0: i32) -> (i32, i32) {
    %c0_i32 = arith.constant 0 : i32
    %c0_i32_0 = arith.constant 0 : i32
    %c0_i32_1 = arith.constant 0 : i32
    return %c0_i32, %c0_i32_0 : i32, i32
  }
  func.func @transform_2(%arg0: i32) -> (i32, i32) {
    %c0_i32 = arith.constant 0 : i32
    %c0_i32_0 = arith.constant 0 : i32
    %c0_i32_1 = arith.constant 0 : i32
    return %c0_i32, %c0_i32_0 : i32, i32
  }
  func.func @transform_3(%arg0: i32) -> (i32, i32) {
    %c0_i32 = arith.constant 0 : i32
    %c0_i32_0 = arith.constant 0 : i32
    return %c0_i32, %arg0 : i32, i32
  }
  func.func @transform_4(%arg0: i32) -> (i32, i32) {
    %c0_i32 = arith.constant 0 : i32
    %c0_i32_0 = arith.constant 0 : i32
    return %c0_i32, %arg0 : i32, i32
  }
  func.func @transform_5(%arg0: i32) -> (i32, i32) {
    %c0_i32 = arith.constant 0 : i32
    %c0_i32_0 = arith.constant 0 : i32
    return %c0_i32, %arg0 : i32, i32
  }
  func.func @transform_6(%arg0: i32) -> (i32, i32) {
    %c0_i32 = arith.constant 0 : i32
    %c0_i32_0 = arith.constant 0 : i32
    return %c0_i32, %arg0 : i32, i32
  }
  func.func @transform_7(%arg0: i32) -> (i32, i32) {
    %c0_i32 = arith.constant 0 : i32
    %c0_i32_0 = arith.constant 0 : i32
    return %c0_i32, %arg0 : i32, i32
  }
}

</mosaic_0001>

<bundles_post_ra>
// kernel: tpu_custom_call.1
= control target key start
LH: loop header
LB: loop body
LE: loop exit
PB: predicated region body
PF: predicated region fallthrough
CT: control target
= control target key end

     0   :  { %13 = vsyncpa [#allocation3], 0  ;;  %s396_s0 = inlined_call_operand.vmem [shape: f32[8,32], index: 0, kind: input, shape index: {}]   ;;  %s397_s1 = inlined_call_operand.vmem [shape: f32[1,128], index: 1, kind: input, shape index: {}]   ;;  %s398_s2 = inlined_call_operand.vmem [shape: f32[1,128], index: 2, kind: input, shape index: {}]   ;;  %s399_s3 = inlined_call_operand.hbm [shape: f32[1,128], index: 3, kind: input, shape index: {}, may-alias: {3,6}]   ;;  %s400_s4 = inlined_call_operand.hbm [shape: f32[1,128], index: 4, kind: input, shape index: {}, may-alias: {4,7}]   ;;  %s401_s5 = inlined_call_operand.hbm [shape: f32[8,32], index: 5, kind: output, shape index: {0}]   ;;  %s402_s6 = inlined_call_operand.hbm [shape: f32[1,128], index: 6, kind: output, shape index: {1}, may-alias: {3,6}]   ;;  %s403_s7 = inlined_call_operand.hbm [shape: f32[1,128], index: 7, kind: output, shape index: {2}, may-alias: {4,7}]  }
   0x1   :  { %14 = vsyncpa [#allocation6], 0 }
   0x2   :  { %15 = vsyncpa [#allocation4], 0 }
   0x3   :  { %16 = vsyncpa [#allocation9], 0  ;;  %s275_s24 = smov [#allocation2]   ;;  %s276_s26 = smov [#allocation5]  }
   0x4   :  { %s29_s25 = sshll.u32 %s275_s24, 4  ;;  %s39_s27 = sshll.u32 %s276_s26, 4  ;;  %s30_s25 = int_to_ptr.vmem [resolvable:$true] %s29_s25  ;;  %s40_s27 = int_to_ptr.vmem [resolvable:$true] %s39_s27 }
   0x5   :  { %s157_s30 = scalar_lea.hbm %s399_s3, 16 }
   0x6   :  { %p158_p0 = scmp.ne.s32.totalorder %s399_s3, %s157_s30  ;;  %p161_p1 = scmp.lt.u32.totalorder %s157_s30, %s399_s3 }
   0x8   :  { %p163_p2 = pnand %p161_p1, %p158_p0 }
   0xa   :  { %166 = shalt.err (!%p163_p2)
}
   0xb   :  { %s167_s12 = scalar_lea.vmem %s30_s25, 16  ;;  %s171_s13 = scalar_lea.vmem %s30_s25, 32 }
   0xc   :  { %p168_p3 = scmp.ne.s32.totalorder %s30_s25, %s167_s12  ;;  %p172_p4 = scmp.lt.s32.totalorder %s30_s25, %s30_s25 }
   0xd   :  { %p173_p5 = scmp.lt.s32.totalorder %s171_s13, %s167_s12 }
   0xf   :  { %p174_p6 = por %p173_p5, %p172_p4 }
  0x11   :  { %p175_p7 = pnand %p174_p6, %p168_p3 }
  0x13   :  { %178 = shalt.err (!%p175_p7)
}
  0x14   :  { %32 = dma.hbm_to_vmem [thread:$0]  %s399_s3, 16, %s30_s25, [#allocation3]  }
  0x15   :  { %s179_s18 = scalar_lea.hbm %s400_s4, 16 }
  0x16   :  { %p180_p8 = scmp.ne.s32.totalorder %s400_s4, %s179_s18  ;;  %p183_p9 = scmp.lt.u32.totalorder %s179_s18, %s400_s4 }
  0x18   :  { %p185_p10 = pnand %p183_p9, %p180_p8 }
  0x1a   :  { %188 = shalt.err (!%p185_p10)
}
  0x1b   :  { %s189_s23 = scalar_lea.vmem %s40_s27, 16  ;;  %s193_s24 = scalar_lea.vmem %s40_s27, 32 }
  0x1c   :  { %p190_p11 = scmp.ne.s32.totalorder %s40_s27, %s189_s23  ;;  %p194_p12 = scmp.lt.s32.totalorder %s40_s27, %s40_s27 }
  0x1d   :  { %p195_p13 = scmp.lt.s32.totalorder %s193_s24, %s189_s23 }
  0x1f   :  { %p196_p0 = por %p195_p13, %p194_p12 }
  0x21   :  { %p197_p1 = pnand %p196_p0, %p190_p11 }
  0x23   :  { %200 = shalt.err (!%p197_p1)
}
  0x24   :  { %42 = dma.hbm_to_vmem [thread:$0]  %s400_s4, 16, %s40_s27, [#allocation6]  }
  0x25   :  { %267 = dma.done.wait [#allocation3], 16  }
  0x26   :  { %268 = vsyncadd [#allocation3], 4294967280 }
  0x27   :  { %269 = dma.done.wait [#allocation6], 16  }
  0x28   :  { %270 = vsyncadd [#allocation6], 4294967280  ;;  %v347_v0 = vld [vmem:[%s396_s0] sm:$0xff]  ;;  %v95_v11 = vld [vmem:[#allocation2] sm:$0x1]  ;;  %s277_s0 = smov [#allocation8]  }
  0x29   :  { %v50_v1 = vrot.slane %v347_v0, 4  ;;  %v56_v2 = vmul.f32 %v347_v0, %v347_v0  ;;  %v96_v15 = vmul.f32 0.9, %v95_v11  ;;  %s121_s4 = sshll.u32 %s277_s0, 4  ;;  %v100_v21 = vld [vmem:[#allocation5] sm:$0x1]  ;;  %s122_s4 = int_to_ptr.vmem [resolvable:$true] %s121_s4 }
  0x2a   :  { %s201_s27 = scalar_lea.vmem %s122_s4, 16  ;;  %s205_s29 = scalar_lea.vmem %s122_s4, 32 }
  0x2b   :  { %v51_v3 = vadd.f32 %v50_v1, %v347_v0  ;;  %v57_v4 = vrot.slane %v56_v2, 4  ;;  %p202_p2 = scmp.ne.s32.totalorder %s122_s4, %s201_s27  ;;  %p206_p3 = scmp.lt.s32.totalorder %s122_s4, %s122_s4 }
  0x2c   :  { %p207_p4 = scmp.lt.s32.totalorder %s205_s29, %s201_s27 }
  0x2d   :  { %v52_v5 = vrot.slane %v51_v3, 2  ;;  %v58_v6 = vadd.f32 %v57_v4, %v56_v2 }
  0x2e   :  { %p208_p5 = por %p207_p4, %p206_p3 }
  0x2f   :  { %v53_v7 = vadd.f32 %v52_v5, %v51_v3  ;;  %v59_v8 = vrot.slane %v58_v6, 2 }
  0x30   :  { %p209_p6 = pnand %p208_p5, %p202_p2 }
  0x31   :  { %v54_v9 = vrot.slane %v53_v7, 1  ;;  %v60_v10 = vadd.f32 %v59_v8, %v58_v6 }
  0x33   :  { %v55_v12 = vadd.f32 %v54_v9, %v53_v7  ;;  %v61_v13 = vrot.slane %v60_v10, 1 }
  0x35   :  { %v63_v14 = vmul.f32 0.125, %v55_v12  ;;  %v62_v16 = vadd.f32 %v61_v13, %v60_v10 }
  0x37   :  { %v64_v17 = vmul.f32 %v63_v14, %v63_v14  ;;  %v97_v18 = vmul.f32 0.1, %v63_v14 }
  0x39   :  { %v65_v19 = vmul.f32 8.0, %v64_v17  ;;  %v98_v20 = vadd.f32 %v97_v18, %v96_v15 }
  0x3b   :  { %v66_v22 = vsub.f32 %v62_v16, %v65_v19  ;;  %99 = vst [vmem:[#allocation8] sm:$0x1] %v98_v20 }
  0x3c   :  { %212 = shalt.err (!%p209_p6)
}
  0x3d   :  { %s213_s9 = scalar_lea.hbm %s402_s6, 16 }
  0x3e   :  { %p214_p7 = scmp.ne.s32.totalorder %s402_s6, %s213_s9  ;;  %p217_p8 = scmp.lt.u32.totalorder %s213_s9, %s402_s6 }
  0x40   :  { %p219_p9 = pnand %p217_p8, %p214_p7 }
  0x42   :  { %222 = shalt.err (!%p219_p9)
}
  0x43   :  { %124 = dma.vmem_to_hbm [thread:$0]  %s122_s4, 16, %s402_s6, [#allocation9]   ;;  %v67_v23 = vmul.f32 0.14285715, %v66_v22  ;;  %v101_v24 = vmul.f32 0.9, %v100_v21  ;;  %v81_v28 = vlaneseq }
  0x44   :  { %s278_s16 = smov [#allocation10]  }
  0x45   :  { %s131_s17 = sshll.u32 %s278_s16, 4  ;;  %v75_v25 = vadd.f32 1e-05, %v67_v23  ;;  %v102_v26 = vmul.f32 0.1, %v67_v23  ;;  %s132_s17 = int_to_ptr.vmem [resolvable:$true] %s131_s17 }
  0x46   :  { %s223_s18 = scalar_lea.vmem %s132_s17, 16  ;;  %s227_s19 = scalar_lea.vmem %s132_s17, 32 }
  0x47   :  { %155 = vrsqrt.f32 %v75_v25  ;;  %v103_v27 = vadd.f32 %v102_v26, %v101_v24  ;;  %p224_p10 = scmp.ne.s32.totalorder %s132_s17, %s223_s18  ;;  %p228_p11 = scmp.lt.s32.totalorder %s132_s17, %s132_s17 }
  0x48   :  { %p229_p12 = scmp.lt.s32.totalorder %s227_s19, %s223_s18 }
  0x49   :  { %104 = vst [vmem:[#allocation10] sm:$0x1] %v103_v27 }
  0x4a   :  { %p230_p13 = por %p229_p12, %p228_p11 }
  0x4c   :  { %p231_p0 = pnand %p230_p13, %p224_p10 }
  0x4e   :  { %234 = shalt.err (!%p231_p0)
}
  0x4f   :  { %s235_s21 = scalar_lea.hbm %s403_s7, 16 }
  0x50   :  { %p236_p1 = scmp.ne.s32.totalorder %s403_s7, %s235_s21  ;;  %p239_p2 = scmp.lt.u32.totalorder %s235_s21, %s403_s7 }
  0x52   :  { %p241_p3 = pnand %p239_p2, %p236_p1 }
  0x54   :  { %244 = shalt.err (!%p241_p3)
}
  0x55   :  { %134 = dma.vmem_to_hbm [thread:$0]  %s132_s17, 16, %s403_s7, [#allocation9]   ;;  %v82_v29 = vshrl.u32 %v81_v28, 7  ;;  %v72_v30 = vld [vmem:[%s397_s1] sm:$0x1]  ;;  %v156_v32 = vpop.eup %155 }
  0x56   :  { %v77_v33 = vmul.f32 %v156_v32, %v72_v30  ;;  %v74_v34 = vld [vmem:[%s398_s2] sm:$0x1]  ;;  %s279_s29 = smov [#allocation7]  }
  0x57   :  { %v83_v31 = vsub.s32 0, %v82_v29  ;;  %s111_s30 = sshll.u32 %s279_s29, 4  ;;  %s112_s30 = int_to_ptr.vmem [resolvable:$true] %s111_s30 }
  0x58   :  { %v78_v35 = vmul.f32 %v77_v33, %v63_v14  ;;  %s245_s7 = scalar_lea.vmem %s112_s30, 128  ;;  %p250_p5 = scmp.lt.s32.totalorder %s112_s30, %s112_s30 }
  0x59   :  { %v84_v36 = vrot.slane %v77_v33, %v83_v31  ;;  %p246_p4 = scmp.ne.s32.totalorder %s112_s30, %s245_s7  ;;  %p251_p6 = scmp.lt.s32.totalorder %s245_s7, %s245_s7 }
  0x5a   :  { %v79_v37 = vsub.f32 %v74_v34, %v78_v35 }
  0x5b   :  { %v86_v38 = vmul.f32 %v84_v36, %v347_v0  ;;  %p252_p7 = por %p251_p6, %p250_p5 }
  0x5c   :  { %v91_v39 = vrot.slane %v79_v37, %v83_v31 }
  0x5d   :  { %p253_p8 = pnand %p252_p7, %p246_p4 }
  0x5e   :  { %v93_v40 = vadd.f32 %v91_v39, %v86_v38 }
  0x60   :  { %94 = vst [vmem:[#allocation7] sm:$0xff] %v93_v40 }
  0x61   :  { %256 = shalt.err (!%p253_p8)
}
  0x62   :  { %s257_s8 = scalar_lea.hbm %s401_s5, 128 }
  0x63   :  { %p258_p9 = scmp.ne.s32.totalorder %s401_s5, %s257_s8  ;;  %p261_p10 = scmp.lt.u32.totalorder %s257_s8, %s401_s5 }
  0x65   :  { %p263_p11 = pnand %p261_p10, %p258_p9 }
  0x67   :  { %266 = shalt.err (!%p263_p11)
}
  0x68   :  { %114 = dma.vmem_to_hbm [thread:$0]  %s112_s30, 128, %s401_s5, [#allocation4]  }
  0x69   :  { %271 = dma.done.wait [#allocation4], 128  }
  0x6a   :  { %272 = vsyncadd [#allocation4], 4294967168 }
  0x6b   :  { %273 = dma.done.wait [#allocation9], 32  }
  0x6c   :  { %274 = vsyncadd [#allocation9], 4294967264 }
  0x6d   :  { %144 = vsyncpa [#allocation3], 1 }
  0x6e   :  { %145 = vsyncpa [#allocation6], 1 }
  0x6f   :  { %146 = vsyncpa [#allocation4], 1 }
  0x70   :  { %147 = vsyncpa [#allocation9], 1 }

</bundles_post_ra>
